<compile_context>
chip_gen: v6e
topology: v6e:2x2x1
jax: 0.10.0
libtpu: 0.0.40
codegen_flags: <defaults>
</compile_context>

<pallas_src>
import functools
import math

import jax
import jax.numpy as jnp
from jax.experimental import pallas as pl
from jax.experimental.pallas import tpu as pltpu


# MXU input dtype.  f32 accumulation everywhere; elementwise math stays f32.
MATMUL_DTYPE = jnp.bfloat16


def _round_up(x, m):
    return ((x + m - 1) // m) * m


def _vmem_limit(block_bytes):
    # Explicit VMEM budget: at least the 32 MiB default, at most a v7x-safe 64 MiB.
    return int(min(max(2 * block_bytes, 32 << 20), 64 << 20))


@functools.lru_cache(maxsize=1)
def _default_tile_caps():
    """(tm_cap, tn_cap, tk_cap) per TPU generation."""
    try:
        kind = jax.devices()[0].device_kind.lower()
    except Exception:  # pragma: no cover - defensive
        kind = ""
    if "v5 lite" in kind or "v5e" in kind or "v5litepod" in kind:
        # v5e: 4x128x128 MXU -> 128-wide tiles; lowest HBM BW.
        return (128, 128, 512)
    if "v6" in kind:
        # v6e: 128 MiB VMEM -> larger K/N tiles amortize per-grid-step overhead.
        return (256, 512, 2048)
    # v7x (64 MiB VMEM) and unknown chips: keep double-buffered blocks modest.
    return (256, 256, 1024)


# ----------------------------------------------------------------------------
# Tiled linear kernel: o = act(x @ w + b)
#   - x, w arrive pre-cast to bf16 (no in-kernel operand casts), bias f32.
#   - when out dtype is f32 the accumulator is the output block itself.
# ----------------------------------------------------------------------------

def _linear_kernel(x_ref, w_ref, b_ref, o_ref, *acc, activation):
    acc_ref = acc[0] if acc else o_ref
    k = pl.program_id(2)

    @pl.when(k == 0)
    def _():
        acc_ref[...] = jnp.zeros_like(acc_ref)

    acc_ref[...] += jnp.dot(x_ref[...], w_ref[...],
                            preferred_element_type=jnp.float32)

    @pl.when(k == pl.num_programs(2) - 1)
    def _():
        out = acc_ref[...] + b_ref[...]
        if activation == "relu":
            out = jnp.maximum(out, 0.0)
        o_ref[...] = out.astype(o_ref.dtype)


def pallas_linear(x, w, b, activation="none", out_dtype=jnp.float32,
                  tile_caps=None):
    """x:(M,K) @ w:(Kp,Np) + b:(1,Np).

    `w`/`b` are expected pre-padded (Kp, Np multiples of 128) and `w` pre-cast
    to bf16 at init time.  Only x is padded here (rows of zeros: exact).
    Returns (M, Np) in `out_dtype` (caller slices valid columns if needed).
    """
    M, K = x.shape
    Kp, Np = w.shape
    assert Kp % 128 == 0 and Np % 128 == 0 and Kp >= K
    assert b.shape == (1, Np)
    if tile_caps is None:
        tile_caps = _default_tile_caps()
    tm_cap, tn_cap, tk_cap = tile_caps

    if x.dtype != MATMUL_DTYPE:
        x = x.astype(MATMUL_DTYPE)

    tm = min(tm_cap, _round_up(M, 8))
    Mp = _round_up(M, tm)
    tn = Np if Np <= tn_cap else math.gcd(Np, tn_cap)
    tk = Kp if Kp <= tk_cap else math.gcd(Kp, tk_cap)

    if Mp > M or Kp > K:
        x = jnp.pad(x, ((0, Mp - M), (0, Kp - K)))

    use_scratch = jnp.dtype(out_dtype) != jnp.dtype(jnp.float32)
    out_bytes = jnp.dtype(out_dtype).itemsize
    blk_bytes = (2 * tm * tk * 2 + 2 * tk * tn * 2 + 2 * tn * 4
                 + 2 * tm * tn * out_bytes
                 + (tm * tn * 4 if use_scratch else 0))

    out = pl.pallas_call(
        functools.partial(_linear_kernel, activation=activation),
        out_shape=jax.ShapeDtypeStruct((Mp, Np), out_dtype),
        grid=(Mp // tm, Np // tn, Kp // tk),
        in_specs=[
            pl.BlockSpec((tm, tk), lambda i, j, k: (i, k)),
            pl.BlockSpec((tk, tn), lambda i, j, k: (k, j)),
            pl.BlockSpec((1, tn), lambda i, j, k: (0, j)),
        ],
        out_specs=pl.BlockSpec((tm, tn), lambda i, j, k: (i, j)),
        scratch_shapes=([pltpu.VMEM((tm, tn), jnp.float32)]
                        if use_scratch else []),
        compiler_params=pltpu.CompilerParams(
            dimension_semantics=("parallel", "parallel", "arbitrary"),
            vmem_limit_bytes=_vmem_limit(blk_bytes)),
    )(x, w, b)
    return out[:M]


# ----------------------------------------------------------------------------
# Fused encoder head: ReLU -> global-avg-pool -> Linear -> BatchNorm1d
# Streams (B, C, HW) bf16 in HW tiles, accumulating the pool in f32 scratch.
# ----------------------------------------------------------------------------

def _encoder_head_kernel(x_ref, w_ref, b_ref, g_ref, beta_ref, o_ref, pool_scr,
                         *, hw_total):
    i = pl.program_id(0)

    @pl.when(i == 0)
    def _():
        pool_scr[...] = jnp.zeros_like(pool_scr)

    x = jnp.maximum(x_ref[...].astype(jnp.float32), 0.0)   # ReLU, (B, C, t_hw)
    pool_scr[...] += jnp.sum(x, axis=-1)                    # f32 pool accumulator

    @pl.when(i == pl.num_programs(0) - 1)
    def _():
        pooled = (pool_scr[...] * (1.0 / hw_total)).astype(MATMUL_DTYPE)  # (B, C)
        y = jnp.dot(pooled, w_ref[...],
                    preferred_element_type=jnp.float32) + b_ref[...]      # (B, E)
        # BatchNorm1d, training-mode batch statistics (biased variance).
        # TODO(synk): if B is ever tiled, BN stats need a second reduction pass.
        mean = jnp.mean(y, axis=0, keepdims=True)
        var = jnp.mean((y - mean) ** 2, axis=0, keepdims=True)
        y = (y - mean) * jax.lax.rsqrt(var + 1e-5)
        o_ref[...] = (y * g_ref[...] + beta_ref[...]).astype(o_ref.dtype)


def _pick_hw_tile(hw_padded, batch, channels, bytes_per_elem=2, budget=8 << 20):
    """Largest multiple-of-128 divisor of hw_padded whose double-buffered
    (B, C, t_hw) block fits the VMEM budget."""
    for cand in range(hw_padded, 127, -128):
        if hw_padded % cand == 0 and 2 * batch * channels * cand * bytes_per_elem <= budget:
            return cand
    return 128


def pallas_encoder_head(conv_act, w_fc, b_fc, gamma, beta, hw_valid):
    """conv_act: (B, C_pad, HW_pad) bf16; returns (B, E_pad) bf16."""
    B, C, HWp = conv_act.shape
    E = w_fc.shape[1]
    t_hw = _pick_hw_tile(HWp, B, C)
    est = (2 * B * C * t_hw * 2 + 2 * C * E * 2 + 3 * 2 * E * 4
           + 2 * B * E * 2 + B * C * 4)
    return pl.pallas_call(
        functools.partial(_encoder_head_kernel, hw_total=float(hw_valid)),
        out_shape=jax.ShapeDtypeStruct((B, E), MATMUL_DTYPE),
        grid=(HWp // t_hw,),
        in_specs=[
            pl.BlockSpec((B, C, t_hw), lambda i: (0, 0, i)),
            pl.BlockSpec((C, E), lambda i: (0, 0)),
            pl.BlockSpec((1, E), lambda i: (0, 0)),
            pl.BlockSpec((1, E), lambda i: (0, 0)),
            pl.BlockSpec((1, E), lambda i: (0, 0)),
        ],
        out_specs=pl.BlockSpec((B, E), lambda i: (0, 0)),
        scratch_shapes=[pltpu.VMEM((B, C), jnp.float32)],
        compiler_params=pltpu.CompilerParams(
            dimension_semantics=("arbitrary",),
            vmem_limit_bytes=_vmem_limit(est)),
    )(conv_act, w_fc, b_fc, gamma, beta)


# ----------------------------------------------------------------------------
# LSTM: whole-sequence kernel.
#   - batch sharded over a "parallel" grid axis (2-TC split on v7x),
#   - x_proj kept in HBM; per-timestep (tb, 4H) bf16 slices double-buffered
#     via make_async_copy inside pl.loop (prefetch t+1 while computing t),
#   - h/c recurrence state f32 in VMEM, hidden output emitted bf16.
# Hidden size is padded to a multiple of 128 -> gate slices are lane-aligned.
# Note: per-step cost is dominated by the single-slot EUP (sigmoid/tanh) plus
# the serial recurrence, not the MXU — keep B per invocation large.
# ----------------------------------------------------------------------------

def _lstm_seq_kernel(xproj_hbm, whh_ref, hout_ref, xbuf, sem, h_scr, c_scr,
                     *, hidden, seq_len, batch_tile):
    H, T, tb = hidden, seq_len, batch_tile
    boff = pl.program_id(0) * tb

    def xcopy(t, slot):
        return pltpu.make_async_copy(
            xproj_hbm.at[t, pl.ds(boff, tb)], xbuf.at[slot], sem.at[slot])

    h_scr[...] = jnp.zeros_like(h_scr)
    c_scr[...] = jnp.zeros_like(c_scr)
    xcopy(0, 0).start()                                   # prime slot 0

    @pl.loop(0, T)
    def _(t):
        slot = t & 1
        xcopy(t, slot).wait()

        @pl.when(t + 1 < T)
        def _():
            xcopy(t + 1, 1 - slot).start()                # prefetch next step

        h = h_scr[...]
        c = c_scr[...]
        gates = xbuf[slot].astype(jnp.float32) + jnp.dot(
            h.astype(MATMUL_DTYPE), whh_ref[...],
            preferred_element_type=jnp.float32)
        # PyTorch gate order (i, f, g, o); H is a multiple of 128 so every
        # slice is lane-aligned (pure VPU/EUP work, no lane shifts).
        i_g = jax.nn.sigmoid(gates[:, 0 * H:1 * H])
        f_g = jax.nn.sigmoid(gates[:, 1 * H:2 * H])
        g_g = jnp.tanh(gates[:, 2 * H:3 * H])
        o_g = jax.nn.sigmoid(gates[:, 3 * H:4 * H])
        c_new = f_g * c + i_g * g_g
        h_new = o_g * jnp.tanh(c_new)
        h_scr[...] = h_new
        c_scr[...] = c_new
        hout_ref[t] = h_new.astype(hout_ref.dtype)


def pallas_lstm_layer(x_proj, w_hh_t, hidden):
    """x_proj: (T, B, 4*H_pad) bf16 time-major (already x@W_ih^T + b);
    returns (T, B, H_pad) bf16."""
    T, B, G = x_proj.shape
    H = hidden
    assert G == 4 * H
    # Batch split for the v7x 2-TC megacore (requires sublane-aligned tiles).
    tb = B // 2 if (B % 2 == 0 and (B // 2) % 8 == 0) else B
    nb = B // tb
    # TODO(synk): for very long T also stream hout back to HBM per timestep.
    est = (2 * T * tb * H * 2       # hout block (double-buffered)
           + 2 * H * G * 2          # w_hh block
           + 2 * tb * G * 2         # xbuf double buffer
           + 2 * tb * H * 4)        # h, c state
    return pl.pallas_call(
        functools.partial(_lstm_seq_kernel, hidden=H, seq_len=T, batch_tile=tb),
        out_shape=jax.ShapeDtypeStruct((T, B, H), MATMUL_DTYPE),
        grid=(nb,),
        in_specs=[
            pl.BlockSpec(memory_space=pl.ANY),            # x_proj stays in HBM
            pl.BlockSpec((H, G), lambda b: (0, 0)),
        ],
        out_specs=pl.BlockSpec((T, tb, H), lambda b: (0, b, 0)),
        scratch_shapes=[
            pltpu.VMEM((2, tb, G), MATMUL_DTYPE),         # per-timestep x slices
            pltpu.SemaphoreType.DMA((2,)),
            pltpu.VMEM((tb, H), jnp.float32),             # h
            pltpu.VMEM((tb, H), jnp.float32),             # c
        ],
        compiler_params=pltpu.CompilerParams(
            dimension_semantics=("parallel",),
            vmem_limit_bytes=_vmem_limit(est)),
    )(x_proj, w_hh_t)


# ----------------------------------------------------------------------------
# Model glue
# ----------------------------------------------------------------------------

def image_encoder_forward(params, images_nchw):
    # TODO(synk): stand-in backbone: single 3x3 SAME conv via lax.conv (the
    # real pretrained CNN is not in the given source); Pallas handles the
    # fused ReLU -> pool -> Linear -> BatchNorm head.
    conv = jax.lax.conv_general_dilated(
        images_nchw, params["w_conv"], window_strides=(1, 1), padding="SAME",
        dimension_numbers=("NCHW", "OIHW", "NCHW"))
    conv = conv + params["b_conv"][None, :, None, None]        # (B, C, H, W)
    B, C, H, W = conv.shape
    HW = H * W
    C_pad = params["c_conv_pad"]
    HW_pad = _round_up(HW, 128)
    act = conv.reshape(B, C, HW)
    act = jnp.pad(act, ((0, 0), (0, C_pad - C), (0, HW_pad - HW)))
    act = act.astype(MATMUL_DTYPE)      # halve HBM bytes into the streaming head
    # TODO(synk): shard B over the v7x 2-TC mesh once BN uses a 2-pass reduce.
    return pallas_encoder_head(act, params["w_fc_t"], params["b_fc"],
                               params["bn_gamma"], params["bn_beta"], HW)


def text_decoder_forward(params, features, captions, lengths):
    H_pad = params["d_hidden_pad"]
    V = params["d_vocab"]
    emb = jnp.take(params["embed"], captions, axis=0)          # (B, T, E_pad) bf16
    emb_tm = jnp.swapaxes(emb, 0, 1)                           # (T, B, E_pad)
    x = jnp.concatenate([features[None, :, :], emb_tm], axis=0)  # (T+1, B, E_pad)
    Tp1, B, _ = x.shape

    for layer in params["lstm"]:
        in_dim = x.shape[-1]
        xp = pallas_linear(x.reshape(Tp1 * B, in_dim),
                           layer["w_ih_t"], layer["b_gate"],
                           out_dtype=MATMUL_DTYPE)             # (Tp1*B, 4H_pad) bf16
        xp = xp.reshape(Tp1, B, 4 * H_pad)
        x = pallas_lstm_layer(xp, layer["w_hh_t"], H_pad)      # (Tp1, B, H_pad) bf16

    # pack_padded_sequence ordering (time-major; lengths sorted descending,
    # enforce_sorted=True).  Row selection happens BEFORE the vocab projection
    # so only valid rows are projected (row-wise -> bit-identical).
    rows = []
    for t in range(max(lengths)):
        for b in range(len(lengths)):
            if lengths[b] > t:
                rows.append(t * B + b)
    hidden_packed = jnp.take(x.reshape(Tp1 * B, H_pad),
                             jnp.array(rows, dtype=jnp.int32), axis=0)

    logits = pallas_linear(hidden_packed, params["w_out_t"], params["b_out"],
                           out_dtype=jnp.float32)              # (sum(len), V_pad)
    return logits[:, :V]


def img2txt_forward(params, images, captions, lengths):
    features = image_encoder_forward(params, images)
    return text_decoder_forward(params, features, captions, lengths)


# ----------------------------------------------------------------------------
# Deterministic parameter construction (pre-padded to aligned dims, weights
# pre-cast to bf16 so no per-call padding/casting of constants is needed).
# ----------------------------------------------------------------------------

def _pad_gate_mat(w, H, H_pad):
    """(4H, in) -> (4*H_pad, in), padding each of the i/f/g/o blocks."""
    in_dim = w.shape[1]
    w4 = w.reshape(4, H, in_dim)
    w4 = jnp.pad(w4, ((0, 0), (0, H_pad - H), (0, 0)))
    return w4.reshape(4 * H_pad, in_dim)


def _pad_gate_vec(b, H, H_pad):
    return jnp.pad(b.reshape(4, H), ((0, 0), (0, H_pad - H))).reshape(4 * H_pad)


def init_params(key, d_embed, d_hidden, d_vocab, d_layers, c_in=3, c_conv=8):
    H, E, V = d_hidden, d_embed, d_vocab
    H_pad = _round_up(H, 128)
    E_pad = _round_up(E, 128)
    V_pad = _round_up(V, 128)
    C_pad = _round_up(c_conv, 8)

    keys = jax.random.split(key, 16 + 4 * d_layers)
    kit = iter(keys)

    def rnd(shape, scale=0.05):
        return scale * jax.random.normal(next(kit), shape, dtype=jnp.float32)

    # encoder linear (PyTorch weight (E, C)) -> transposed + padded (C_pad, E_pad)
    w_fc = rnd((E, c_conv)).T
    w_fc = jnp.pad(w_fc, ((0, C_pad - c_conv), (0, E_pad - E)))

    params = {
        "d_embed": E,
        "d_hidden": H,
        "d_vocab": V,
        "d_hidden_pad": H_pad,
        "c_conv_pad": C_pad,
        "w_conv": rnd((c_conv, c_in, 3, 3)),
        "b_conv": rnd((c_conv,)),
        "w_fc_t": w_fc.astype(MATMUL_DTYPE),
        "b_fc": jnp.pad(rnd((E,)), (0, E_pad - E)).reshape(1, E_pad),
        "bn_gamma": jnp.pad(jnp.ones((E,), jnp.float32),
                            (0, E_pad - E)).reshape(1, E_pad),
        "bn_beta": jnp.zeros((1, E_pad), jnp.float32),
        "embed": jnp.pad(rnd((V, E)),
                         ((0, 0), (0, E_pad - E))).astype(MATMUL_DTYPE),
        # output linear: PyTorch (V, H) -> (H_pad, V_pad), padded rows/cols zero
        "w_out_t": jnp.pad(rnd((V, H)).T,
                           ((0, H_pad - H), (0, V_pad - V))).astype(MATMUL_DTYPE),
        "b_out": jnp.pad(rnd((V,)), (0, V_pad - V)).reshape(1, V_pad),
        "lstm": [],
    }

    for layer in range(d_layers):
        in_raw = E if layer == 0 else H
        in_pad = E_pad if layer == 0 else H_pad
        w_ih = rnd((4 * H, in_raw))
        w_hh = rnd((4 * H, H))
        b_ih = rnd((4 * H,))
        b_hh = rnd((4 * H,))

        w_ih_p = _pad_gate_mat(w_ih, H, H_pad)                      # (4H_pad, in_raw)
        w_ih_p = jnp.pad(w_ih_p, ((0, 0), (0, in_pad - in_raw))).T  # (in_pad, 4H_pad)
        w_hh_p = _pad_gate_mat(w_hh, H, H_pad)                      # (4H_pad, H)
        w_hh_p = jnp.pad(w_hh_p, ((0, 0), (0, H_pad - H))).T        # (H_pad, 4H_pad)

        params["lstm"].append({
            "w_ih_t": w_ih_p.astype(MATMUL_DTYPE),
            "w_hh_t": w_hh_p.astype(MATMUL_DTYPE),
            "b_gate": _pad_gate_vec(b_ih + b_hh, H, H_pad).reshape(1, 4 * H_pad),
        })
    return params


# ----------------------------------------------------------------------------

if __name__ == "__main__":
    d_embed, d_hidden, d_vocab, d_layers, d_max_seq_len = 32, 32, 48, 2, 8
    B = 2

    key = jax.random.PRNGKey(0)
    k_img, k_cap, k_par = jax.random.split(key, 3)

    images = jax.random.normal(k_img, (B, 3, 16, 16), dtype=jnp.float32)   # NCHW
    captions = jax.random.randint(k_cap, (B, d_max_seq_len), 0, d_vocab,
                                  dtype=jnp.int32)
    lengths = [7, 5]   # sorted descending, <= d_max_seq_len + 1

    params = init_params(k_par, d_embed, d_hidden, d_vocab, d_layers)

    logits = img2txt_forward(params, images, captions, lengths)
    logits = jax.block_until_ready(logits)

    assert logits.shape == (sum(lengths), d_vocab), logits.shape
    assert bool(jnp.all(jnp.isfinite(logits)))
    print("KERNEL_OK")
</pallas_src>

<mosaic_0001>
module attributes {stable_mosaic.version = 11 : i64} {
  func.func @_encoder_head_kernel(%arg0: i32, %arg1: memref<2x8x256xbf16, #tpu.memory_space<vmem>>, %arg2: memref<8x128xbf16, #tpu.memory_space<vmem>>, %arg3: memref<1x128xf32, #tpu.memory_space<vmem>>, %arg4: memref<1x128xf32, #tpu.memory_space<vmem>>, %arg5: memref<1x128xf32, #tpu.memory_space<vmem>>, %arg6: memref<2x128xbf16, #tpu.memory_space<vmem>>, %arg7: memref<2x8xf32, #tpu.memory_space<vmem>>) attributes {dimension_semantics = [#tpu.dimension_semantics<arbitrary>], iteration_bounds = array<i64: 1>, scalar_prefetch = 0 : i64, scratch_operands = 1 : i64, tpu.core_type = #tpu.core_type<tc>, window_params = [{transform_indices = @transform_0, window_bounds = array<i64: 2, 8, 256>}, {pipeline_mode = #tpu.pipeline_mode<synchronous>, transform_indices = @transform_1, window_bounds = array<i64: 8, 128>}, {pipeline_mode = #tpu.pipeline_mode<synchronous>, transform_indices = @transform_2, window_bounds = array<i64: 1, 128>}, {pipeline_mode = #tpu.pipeline_mode<synchronous>, transform_indices = @transform_3, window_bounds = array<i64: 1, 128>}, {pipeline_mode = #tpu.pipeline_mode<synchronous>, transform_indices = @transform_4, window_bounds = array<i64: 1, 128>}, {pipeline_mode = #tpu.pipeline_mode<synchronous>, transform_indices = @transform_5, window_bounds = array<i64: 2, 128>}]} {
    %c0_i32 = arith.constant 0 : i32
    %0 = arith.cmpi eq, %arg0, %c0_i32 : i32
    %1 = arith.extui %0 : i1 to i32
    %c0_i32_0 = arith.constant 0 : i32
    %2 = arith.cmpi ne, %1, %c0_i32_0 : i32
    scf.if %2 {
      %cst_10 = arith.constant 0.000000e+00 : f32
      %14 = vector.broadcast %cst_10 : f32 to vector<2x8xf32>
      %c0_11 = arith.constant 0 : index
      %c0_12 = arith.constant 0 : index
      %15 = vector.load %arg7[%c0_11, %c0_12] : memref<2x8xf32, #tpu.memory_space<vmem>>, vector<2x8xf32>
      tpu.vector_store %arg7[%c0_11, %c0_12], %14 {strides = array<i32>} : memref<2x8xf32, #tpu.memory_space<vmem>>, vector<2x8xf32>,
    } else {
    }
    %c0 = arith.constant 0 : index
    %c0_1 = arith.constant 0 : index
    %c0_2 = arith.constant 0 : index
    %3 = vector.load %arg1[%c0, %c0_1, %c0_2] : memref<2x8x256xbf16, #tpu.memory_space<vmem>>, vector<2x8x256xbf16>
    %4 = arith.extf %3 : vector<2x8x256xbf16> to vector<2x8x256xf32>
    %cst = arith.constant 0.000000e+00 : f32
    %5 = vector.broadcast %cst : f32 to vector<2x8x256xf32>
    %6 = arith.maximumf %4, %5 : vector<2x8x256xf32>
    %c0_3 = arith.constant 0 : index
    %c0_4 = arith.constant 0 : index
    %7 = vector.load %arg7[%c0_3, %c0_4] : memref<2x8xf32, #tpu.memory_space<vmem>>, vector<2x8xf32>
    %cst_5 = arith.constant dense<0.000000e+00> : vector<2x8xf32>
    %8 = vector.multi_reduction <add>, %6, %cst_5 [2] : vector<2x8x256xf32> to vector<2x8xf32>
    %9 = arith.addf %7, %8 : vector<2x8xf32>
    %c0_6 = arith.constant 0 : index
    %c0_7 = arith.constant 0 : index
    %10 = vector.load %arg7[%c0_6, %c0_7] : memref<2x8xf32, #tpu.memory_space<vmem>>, vector<2x8xf32>
    tpu.vector_store %arg7[%c0_6, %c0_7], %9 {strides = array<i32>} : memref<2x8xf32, #tpu.memory_space<vmem>>, vector<2x8xf32>,
    %c0_i32_8 = arith.constant 0 : i32
    %11 = arith.cmpi eq, %arg0, %c0_i32_8 : i32
    %12 = arith.extui %11 : i1 to i32
    %c0_i32_9 = arith.constant 0 : i32
    %13 = arith.cmpi ne, %12, %c0_i32_9 : i32
    scf.if %13 {
      %c0_10 = arith.constant 0 : index
      %c0_11 = arith.constant 0 : index
      %14 = vector.load %arg7[%c0_10, %c0_11] : memref<2x8xf32, #tpu.memory_space<vmem>>, vector<2x8xf32>
      %cst_12 = arith.constant 3.906250e-03 : f32
      %15 = vector.broadcast %cst_12 : f32 to vector<2x8xf32>
      %16 = arith.mulf %14, %15 : vector<2x8xf32>
      %17 = arith.truncf %16 : vector<2x8xf32> to vector<2x8xbf16>
      %c0_13 = arith.constant 0 : index
      %c0_14 = arith.constant 0 : index
      %18 = vector.load %arg2[%c0_13, %c0_14] : memref<8x128xbf16, #tpu.memory_space<vmem>>, vector<8x128xbf16>
      %cst_15 = arith.constant dense<0.000000e+00> : vector<2x128xf32>
      %19 = tpu.matmul %17, %18, %cst_15 {dimension_numbers = #tpu.dot_dimension_numbers<[1], [0], [0], [1], [0, 0, 1, 1], [], []>} : vector<2x8xbf16>, vector<8x128xbf16>, vector<2x128xf32> -> vector<2x128xf32>
      %c0_16 = arith.constant 0 : index
      %c0_17 = arith.constant 0 : index
      %20 = vector.load %arg3[%c0_16, %c0_17] : memref<1x128xf32, #tpu.memory_space<vmem>>, vector<1x128xf32>
      %21 = vector.broadcast %20 : vector<1x128xf32> to vector<2x128xf32>
      %22 = arith.addf %19, %21 : vector<2x128xf32>
      %cst_18 = arith.constant dense<0.000000e+00> : vector<128xf32>
      %23 = vector.multi_reduction <add>, %22, %cst_18 [0] : vector<2x128xf32> to vector<128xf32>
      %24 = vector.shape_cast %23 : vector<128xf32> to vector<1x128xf32>
      %cst_19 = arith.constant 2.000000e+00 : f32
      %25 = vector.broadcast %cst_19 : f32 to vector<1x128xf32>
      %26 = arith.divf %24, %25 : vector<1x128xf32>
      %27 = vector.broadcast %26 : vector<1x128xf32> to vector<2x128xf32>
      %28 = arith.subf %22, %27 : vector<2x128xf32>
      %29 = arith.mulf %28, %28 : vector<2x128xf32>
      %cst_20 = arith.constant dense<0.000000e+00> : vector<128xf32>
      %30 = vector.multi_reduction <add>, %29, %cst_20 [0] : vector<2x128xf32> to vector<128xf32>
      %31 = vector.shape_cast %30 : vector<128xf32> to vector<1x128xf32>
      %cst_21 = arith.constant 2.000000e+00 : f32
      %32 = vector.broadcast %cst_21 : f32 to vector<1x128xf32>
      %33 = arith.divf %31, %32 : vector<1x128xf32>
      %34 = vector.broadcast %26 : vector<1x128xf32> to vector<2x128xf32>
      %35 = arith.subf %22, %34 : vector<2x128xf32>
      %cst_22 = arith.constant 9.99999974E-6 : f32
      %36 = vector.broadcast %cst_22 : f32 to vector<1x128xf32>
      %37 = arith.addf %33, %36 : vector<1x128xf32>
      %38 = math.rsqrt %37 : vector<1x128xf32>
      %39 = vector.broadcast %38 : vector<1x128xf32> to vector<2x128xf32>
      %40 = arith.mulf %35, %39 : vector<2x128xf32>
      %c0_23 = arith.constant 0 : index
      %c0_24 = arith.constant 0 : index
      %41 = vector.load %arg4[%c0_23, %c0_24] : memref<1x128xf32, #tpu.memory_space<vmem>>, vector<1x128xf32>
      %42 = vector.broadcast %41 : vector<1x128xf32> to vector<2x128xf32>
      %43 = arith.mulf %40, %42 : vector<2x128xf32>
      %c0_25 = arith.constant 0 : index
      %c0_26 = arith.constant 0 : index
      %44 = vector.load %arg5[%c0_25, %c0_26] : memref<1x128xf32, #tpu.memory_space<vmem>>, vector<1x128xf32>
      %45 = vector.broadcast %44 : vector<1x128xf32> to vector<2x128xf32>
      %46 = arith.addf %43, %45 : vector<2x128xf32>
      %47 = arith.truncf %46 : vector<2x128xf32> to vector<2x128xbf16>
      %c0_27 = arith.constant 0 : index
      %c0_28 = arith.constant 0 : index
      %48 = vector.load %arg6[%c0_27, %c0_28] : memref<2x128xbf16, #tpu.memory_space<vmem>>, vector<2x128xbf16>
      tpu.vector_store %arg6[%c0_27, %c0_28], %47 {strides = array<i32>} : memref<2x128xbf16, #tpu.memory_space<vmem>>, vector<2x128xbf16>,
    } else {
    }
    return
  }
  func.func @transform_0(%arg0: i32) -> (i32, i32, i32) {
    %c0_i32 = arith.constant 0 : i32
    %c0_i32_0 = arith.constant 0 : i32
    %c0_i32_1 = arith.constant 0 : i32
    return %c0_i32, %c0_i32_0, %arg0 : i32, i32, i32
  }
  func.func @transform_1(%arg0: i32) -> (i32, i32) {
    %c0_i32 = arith.constant 0 : i32
    %c0_i32_0 = arith.constant 0 : i32
    %c0_i32_1 = arith.constant 0 : i32
    return %c0_i32, %c0_i32_0 : i32, i32
  }
  func.func @transform_2(%arg0: i32) -> (i32, i32) {
    %c0_i32 = arith.constant 0 : i32
    %c0_i32_0 = arith.constant 0 : i32
    %c0_i32_1 = arith.constant 0 : i32
    return %c0_i32, %c0_i32_0 : i32, i32
  }
  func.func @transform_3(%arg0: i32) -> (i32, i32) {
    %c0_i32 = arith.constant 0 : i32
    %c0_i32_0 = arith.constant 0 : i32
    %c0_i32_1 = arith.constant 0 : i32
    return %c0_i32, %c0_i32_0 : i32, i32
  }
  func.func @transform_4(%arg0: i32) -> (i32, i32) {
    %c0_i32 = arith.constant 0 : i32
    %c0_i32_0 = arith.constant 0 : i32
    %c0_i32_1 = arith.constant 0 : i32
    return %c0_i32, %c0_i32_0 : i32, i32
  }
  func.func @transform_5(%arg0: i32) -> (i32, i32) {
    %c0_i32 = arith.constant 0 : i32
    %c0_i32_0 = arith.constant 0 : i32
    %c0_i32_1 = arith.constant 0 : i32
    return %c0_i32, %c0_i32_0 : i32, i32
  }
}

</mosaic_0001>

<bundles_post_ra>
// kernel: tpu_custom_call.1
= control target key start
LH: loop header
LB: loop body
LE: loop exit
PB: predicated region body
PF: predicated region fallthrough
CT: control target
= control target key end

     0   :  { %10 = vsyncpa [#allocation4], 0  ;;  %s352_s0 = inlined_call_operand.hbm [shape: bf16[2,8,256], index: 0, kind: input, shape index: {}]   ;;  %s353_s1 = inlined_call_operand.hbm [shape: bf16[8,128], index: 1, kind: input, shape index: {}]   ;;  %s354_s2 = inlined_call_operand.vmem [shape: f32[1,128], index: 2, kind: input, shape index: {}]   ;;  %s355_s3 = inlined_call_operand.vmem [shape: f32[1,128], index: 3, kind: input, shape index: {}]   ;;  %s356_s4 = inlined_call_operand.vmem [shape: f32[1,128], index: 4, kind: input, shape index: {}]   ;;  %s357_s5 = inlined_call_operand.hbm [shape: bf16[2,128], index: 5, kind: output, shape index: {}]  }
   0x1   :  { %11 = vsyncpa [#allocation7], 0 }
   0x2   :  { %12 = vsyncpa [#allocation5], 0  ;;  %s295_s18 = smov [#allocation3]  }
   0x3   :  { %s18_s19 = sshll.u32 %s295_s18, 4  ;;  %s19_s19 = int_to_ptr.vmem [resolvable:$true] %s18_s19 }
   0x4   :  { %s237_s20 = scalar_lea.vmem %s19_s19, 256  ;;  %p242_p1 = scmp.lt.s32.totalorder %s19_s19, %s19_s19 }
   0x5   :  { %p238_p0 = scmp.ne.s32.totalorder %s19_s19, %s237_s20  ;;  %p243_p2 = scmp.lt.s32.totalorder %s237_s20, %s237_s20 }
   0x7   :  { %p244_p3 = por %p243_p2, %p242_p1 }
   0x9   :  { %p245_p4 = pnand %p244_p3, %p238_p0 }
   0xb   :  { %248 = shalt.err (!%p245_p4)
}
   0xc   :  { %s296_s21 = smov 128   ;;  %s297_s22 = smov 8  }
   0xd   :  { %24 = dma.hbm_to_vmem [thread:$0]  %s352_s0, 256, %s19_s19, [#allocation4], %s296_s21, %s296_s21, %s297_s22  }
   0xe   :  { %s298_s25 = smov [#allocation6]  }
   0xf   :  { %s31_s26 = sshll.u32 %s298_s25, 4  ;;  %s32_s26 = int_to_ptr.vmem [resolvable:$true] %s31_s26 }
  0x10   :  { %s257_s27 = scalar_lea.vmem %s32_s26, 64  ;;  %p262_p6 = scmp.lt.s32.totalorder %s32_s26, %s32_s26 }
  0x11   :  { %p258_p5 = scmp.ne.s32.totalorder %s32_s26, %s257_s27  ;;  %p263_p7 = scmp.lt.s32.totalorder %s257_s27, %s257_s27 }
  0x13   :  { %p264_p8 = por %p263_p7, %p262_p6 }
  0x15   :  { %p265_p9 = pnand %p264_p8, %p258_p5 }
  0x17   :  { %268 = shalt.err (!%p265_p9)
}
  0x18   :  { %34 = dma.hbm_to_vmem [thread:$0]  %s353_s1, 64, %s32_s26, [#allocation7]  }
  0x19   :  { %289 = dma.done.wait [#allocation4], 256  }
  0x1a   :  { %290 = vsyncadd [#allocation4], 4294967040 }
  0x1b   :  { %291 = dma.done.wait [#allocation7], 64  }
  0x1c   :  { %292 = vsyncadd [#allocation7], 4294967232  ;;  %v54_v0 = vld [vmem:[#allocation3] sm:$0xff]  ;;  %v55_v1 = vld [vmem:[#allocation3 + $0x8] sm:$0xff]  ;;  %vm52_vm0 = vcmask 58368   ;;  %v299_v12 = vmov 0.0   ;;  %v73_v15 = vlaneseq }
  0x1d   :  { %v56_v2 = vunpack.c.l.bf16 %v54_v0  ;;  %v57_v3 = vunpack.c.h.bf16 %v54_v0  ;;  %v58_v4 = vunpack.c.l.bf16 %v55_v1  ;;  %v59_v5 = vunpack.c.h.bf16 %v55_v1  ;;  %53 = vst.msk [vmem:[#allocation2] sm:$0x3] %vm52_vm0, %v299_v12  ;;  %214 = vmatprep.subr.bf16.mxu0 %v299_v12  ;;  %v95_v13 = vld [vmem:[#allocation6] sm:$0xf]  ;;  %v208_v29 = vld [vmem:[%s354_s2] ss:$0 sm:$0xff] }
  0x1e   :  { %vm107_vm1 = vcmask 1043456   ;;  %vm300_vm2 = vmmov 0   ;;  %v74_v16 = vand.u32 127, %v73_v15  ;;  %v76_v17 = vshrl.u32 %v73_v15, 7  ;;  %v210_v55 = vld [vmem:[%s355_s3] ss:$0 sm:$0xff] }
  0x1f   :  { %v60_v6 = vmax.f32 %v56_v2, 0.0  ;;  %v61_v7 = vmax.f32 %v57_v3, 0.0  ;;  %v62_v8 = vmax.f32 %v58_v4, 0.0  ;;  %v63_v9 = vmax.f32 %v59_v5, 0.0  ;;  %216 = vmatprep.mubr.msk.bf16.mxu0 %vm300_vm2, %v299_v12  ;;  %v211_v57 = vld [vmem:[%s356_s4] ss:$0 sm:$0xff] }
  0x20   :  { %v109_v14 = vsel %vm107_vm1, %v95_v13, 0  ;;  %v77_v19 = vsub.s32 %v74_v16, %v76_v17  ;;  %vm83_vm3 = vcmask 1041409   ;;  %vm103_vm4 = vcmask 64512   ;;  %s301_s8 = smov [#allocation8]  }
  0x21   :  { %v65_v10 = vadd.f32 %v61_v7, %v60_v6  ;;  %v68_v11 = vadd.f32 %v63_v9, %v62_v8  ;;  %215 = vmatpush3.bf16.msra.mxu0 %v109_v14  ;;  %vm151_vm5 = vcmask 1041408   ;;  %s198_s9 = sshll.u32 %s301_s8, 4  ;;  %s199_s9 = int_to_ptr.vmem [resolvable:$true] %s198_s9 }
  0x22   :  { %s269_s10 = scalar_lea.vmem %s199_s9, 16  ;;  %s273_s11 = scalar_lea.vmem %s199_s9, 32 }
  0x23   :  { %66 = vadd.xlane.f32.xlu0 %v65_v10  ;;  %p270_p10 = scmp.ne.s32.totalorder %s199_s9, %s269_s10  ;;  %p274_p11 = scmp.lt.s32.totalorder %s199_s9, %s199_s9 }
  0x24   :  { %v64_v23 = vld [vmem:[#allocation2] sm:$0x3]  ;;  %p275_p12 = scmp.lt.s32.totalorder %s273_s11, %s269_s10 }
  0x26   :  { %p276_p13 = por %p275_p12, %p274_p11 }
  0x27   :  { %69 = vadd.xlane.f32.xlu0 %v68_v11 }
  0x28   :  { %p277_p0 = pnand %p276_p13, %p270_p10 }
  0xac   :  { %v67_v18 = vpop.xlane.xlu0 %66 }
  0xad   :  { %v78_v21 = vrot.slane %v67_v18, %v77_v19 }
  0xb0   :  { %v70_v20 = vpop.xlane.xlu0 %69 }
  0xb1   :  { %v82_v22 = vrot.slane %v70_v20, %v77_v19 }
  0xb3   :  { %v84_v24 = vsel %vm83_vm3, %v82_v22, %v78_v21 }
  0xb4   :  { %v86_v25 = vadd.f32 %v84_v24, %v64_v23 }
  0xb6   :  { %88 = vst.msk [vmem:[#allocation2] sm:$0x3] %vm52_vm0, %v86_v25 }
  0xbd   :  { %v92_v26 = vld [vmem:[#allocation2] sm:$0x3] }
  0xbe   :  { %v93_v27 = vmul.f32 0.00390625, %v92_v26 }
  0xc0   :  { %v94_v28 = vpack.c.bf16 %v93_v27, %v93_v27 }
  0xc2   :  { %217 = vmatmul.mubr.msk.bf16.vlgmr.msra.gmra.mxu0 %vm103_vm4, %v94_v28 }
 0x182   :  { %v145_v30 = vpop.f32.mrf.mxu0 }
 0x183   :  { %v146_v31 = vadd.f32 %v208_v29, %v145_v30 }
 0x184   :  { %v218_v32 = vpop.f32.mrf.mxu0 }
 0x185   :  { %v152_v33 = vsel %vm151_vm5, %v146_v31, 0.0 }
 0x186   :  { %v153_v34 = vrot.slane %v152_v33, 4  ;;  %v148_v35 = vpop.f32.mrf.mxu0 }
 0x188   :  { %v154_v36 = vadd.f32 %v153_v34, %v152_v33  ;;  %v219_v37 = vpop.f32.mrf.mxu0 }
 0x18a   :  { %v155_v38 = vrot.slane %v154_v36, 2 }
 0x18c   :  { %v156_v39 = vadd.f32 %v155_v38, %v154_v36 }
 0x18e   :  { %v157_v40 = vrot.slane %v156_v39, 1 }
 0x190   :  { %v158_v41 = vadd.f32 %v157_v40, %v156_v39 }
 0x192   :  { %v160_v42 = vmul.f32 0.5, %v158_v41 }
 0x194   :  { %v161_v43 = vsub.f32 %v146_v31, %v160_v42 }
 0x196   :  { %v162_v44 = vmul.f32 %v161_v43, %v161_v43 }
 0x198   :  { %v163_v45 = vsel %vm151_vm5, %v162_v44, 0.0 }
 0x199   :  { %v164_v46 = vrot.slane %v163_v45, 4 }
 0x19b   :  { %v165_v47 = vadd.f32 %v164_v46, %v163_v45 }
 0x19d   :  { %v166_v48 = vrot.slane %v165_v47, 2 }
 0x19f   :  { %v167_v49 = vadd.f32 %v166_v48, %v165_v47 }
 0x1a1   :  { %v168_v50 = vrot.slane %v167_v49, 1 }
 0x1a3   :  { %v169_v51 = vadd.f32 %v168_v50, %v167_v49 }
 0x1a5   :  { %v170_v52 = vmul.f32 0.5, %v169_v51 }
 0x1a7   :  { %v171_v53 = vadd.f32 1e-05, %v170_v52 }
 0x1a9   :  { %227 = vrsqrt.f32 %v171_v53 }
 0x1b6   :  { %v228_v54 = vpop.eup %227 }
 0x1b7   :  { %v173_v56 = vmul.f32 %v228_v54, %v161_v43 }
 0x1b9   :  { %v181_v58 = vmul.f32 %v210_v55, %v173_v56 }
 0x1bb   :  { %v189_v59 = vadd.f32 %v211_v57, %v181_v58 }
 0x1bd   :  { %v190_v60 = vpack.c.bf16 %v189_v59, %v189_v59 }
 0x1bf   :  { %191 = vst [vmem:[#allocation8] sm:$0x1] %v190_v60 }
 0x1c0   :  { %280 = shalt.err (!%p277_p0)
}
 0x1c1   :  { %201 = dma.vmem_to_hbm [thread:$0]  %s199_s9, 16, %s357_s5, [#allocation5]  }
 0x1c2   :  { %293 = dma.done.wait [#allocation5], 16  }
 0x1c3   :  { %294 = vsyncadd [#allocation5], 4294967280 }
 0x1c4   :  { %205 = vsyncpa [#allocation4], 1 }
 0x1c5   :  { %206 = vsyncpa [#allocation7], 1 }
 0x1c6   :  { %207 = vsyncpa [#allocation5], 1 }

</bundles_post_ra>
